<compile_context>
chip_gen: v7x
topology: tpu7x:2x2x1
jax: 0.10.0
libtpu: 0.0.40
codegen_flags: <defaults>
</compile_context>

<pallas_src>
import jax
import jax.numpy as jnp
from jax.experimental import pallas as pl
from jax.experimental.pallas import tpu as pltpu


def _round_up(x, m):
    return ((x + m - 1) // m) * m


def _vmem_capacity_bytes():
    """Physical per-core VMEM (64 MiB on v7x, 128 MiB on v5e/v6e); conservative fallback."""
    try:
        info = pltpu.get_tpu_info()
        cap = int(getattr(info, "vmem_capacity_bytes", 0))
        if cap > 0:
            return cap
    except Exception:
        pass
    return 64 << 20


def _tile_vmem_bytes(rows, cols, dtype):
    """Approximate VMEM footprint of a (rows, cols) buffer incl. (8,128) layout padding."""
    itemsize = jnp.dtype(dtype).itemsize
    packing = max(1, 4 // itemsize)  # sub-32-bit dtypes pack along sublanes
    return _round_up(max(rows, 1), 8 * packing) * _round_up(max(cols, 1), 128) * itemsize


def _generator_kernel(data_ref, mask_ref, w1_ref, b1_ref, w2_ref, b2_ref,
                      w3_ref, b3_ref, o_ref, x_ref):
    d = data_ref.shape[1]
    cdt = w1_ref.dtype

    # Fused concat: one cheap VPU copy into a (TB, 2D) VMEM scratch, then a single
    # K=2D MXU pass (instead of two K=D passes) for layer 1.
    x_ref[:, :d] = data_ref[...]
    x_ref[:, d:] = mask_ref[...]

    # Layer 1: Linear(2D -> H) + ReLU (f32 accumulate; bias/ReLU on the f32 accumulator).
    h1 = jnp.dot(x_ref[...], w1_ref[...], preferred_element_type=jnp.float32) + b1_ref[...]
    h1 = jnp.maximum(h1, 0.0).astype(cdt)

    # Layer 2: Linear(H -> H) + ReLU.
    h2 = jnp.dot(h1, w2_ref[...], preferred_element_type=jnp.float32) + b2_ref[...]
    h2 = jnp.maximum(h2, 0.0).astype(cdt)

    # Layer 3: Linear(H -> D) + Sigmoid.
    logits = jnp.dot(h2, w3_ref[...], preferred_element_type=jnp.float32) + b3_ref[...]
    o_ref[...] = jax.nn.sigmoid(logits).astype(o_ref.dtype)


def prepare_params(params, input_dim, *, dtype=jnp.float32):
    """One-time parameter preprocessing (hoisted out of the per-call forward path).

    `params` holds (in_features, out_features)-layout weights:
      w1 (2D, H), b1 (1, H), w2 (H, H), b2 (1, H), w3 (H, D), b3 (1, D).
    Weights are stored in `dtype` (f32 or bf16); biases stay f32 so bias/ReLU/sigmoid
    run on the f32 accumulator.  The output feature dim is padded to a lane multiple
    only when D > 128 and unaligned (pad columns compute sigmoid(0) and are sliced
    off after the kernel); the hidden dim is left unpadded.
    """
    D = int(input_dim)
    w1 = jnp.asarray(params["w1"])
    assert w1.shape[0] == 2 * D, "w1 must have shape (2*input_dim, hidden_dim)"
    H = int(w1.shape[1])
    w2 = jnp.asarray(params["w2"])
    w3 = jnp.asarray(params["w3"])
    b1 = jnp.asarray(params["b1"]).reshape(1, H).astype(jnp.float32)
    b2 = jnp.asarray(params["b2"]).reshape(1, H).astype(jnp.float32)
    b3 = jnp.asarray(params["b3"]).reshape(1, D).astype(jnp.float32)

    Dp = D if (D < 128 or D % 128 == 0) else _round_up(D, 128)
    if Dp != D:
        w3 = jnp.pad(w3, ((0, 0), (0, Dp - D)))
        b3 = jnp.pad(b3, ((0, 0), (0, Dp - D)))

    return {
        "w1": w1.astype(dtype), "b1": b1,
        "w2": w2.astype(dtype), "b2": b2,
        "w3": w3.astype(dtype), "b3": b3,
    }


def generator_forward(data_w_noise, mask, prepared, *, batch_tile=None):
    """GAIN generator forward as one batch-tiled Pallas kernel.

    data_w_noise, mask: (B, D) arrays.  prepared: output of prepare_params().
    """
    w1, b1 = prepared["w1"], prepared["b1"]
    w2, b2 = prepared["w2"], prepared["b2"]
    w3, b3 = prepared["w3"], prepared["b3"]
    cdt = w1.dtype
    H = w1.shape[1]
    Dp = w3.shape[1]

    B, D = data_w_noise.shape
    assert w1.shape[0] == 2 * D

    vmem_capacity = _vmem_capacity_bytes()
    vmem_cap = min((vmem_capacity * 3) // 4, 100 << 20)  # ~48 MiB v7x, ~96 MiB v5e/v6e
    if batch_tile is None:
        batch_tile = 1024 if vmem_capacity >= (100 << 20) else 512

    w_bytes = (_tile_vmem_bytes(2 * D, H, cdt) + _tile_vmem_bytes(H, H, cdt)
               + _tile_vmem_bytes(H, Dp, cdt)
               + 2 * _tile_vmem_bytes(1, H, jnp.float32)
               + _tile_vmem_bytes(1, Dp, jnp.float32))

    def vmem_estimate(tb):
        act = 2 * 2 * _tile_vmem_bytes(tb, D, cdt)                  # data+mask, double-buffered
        act += 2 * _tile_vmem_bytes(tb, Dp, jnp.float32)            # out tile, double-buffered
        act += _tile_vmem_bytes(tb, 2 * D, cdt)                     # fused-concat scratch
        act += 3 * _tile_vmem_bytes(tb, max(H, Dp), jnp.float32)    # live f32 intermediates
        return act + 2 * w_bytes                                    # conservative: params x2

    # Balanced batch tiling; >= 2 grid steps when B > 8 (v7x dual-TC sharding).
    n_tiles = max(1, pl.cdiv(B, batch_tile))
    if n_tiles == 1 and B > 8:
        n_tiles = 2
    TB = _round_up(pl.cdiv(B, n_tiles), 8)
    while vmem_estimate(TB) > vmem_cap and TB > 8:
        n_tiles += 1
        TB = _round_up(pl.cdiv(B, n_tiles), 8)
    Bp = TB * n_tiles

    data = data_w_noise.astype(cdt)
    msk = mask.astype(cdt)
    if Bp != B:
        data = jnp.pad(data, ((0, Bp - B), (0, 0)))
        msk = jnp.pad(msk, ((0, Bp - B), (0, 0)))

    row = lambda i: (i, 0)     # batch-tiled arrays
    fixed = lambda i: (0, 0)   # resident weights / biases

    in_bytes = jnp.dtype(cdt).itemsize
    cost = pl.CostEstimate(
        flops=2 * Bp * (2 * D * H + H * H + H * Dp),
        transcendentals=Bp * Dp,  # sigmoid exp
        bytes_accessed=(in_bytes * 2 * Bp * D + 4 * Bp * Dp
                        + in_bytes * (2 * D * H + H * H + H * Dp)
                        + 4 * (2 * H + Dp)),
    )
    vmem_limit = int(min(max(2 * vmem_estimate(TB), 4 << 20), vmem_cap))

    def run(single_buffer_weights):
        if single_buffer_weights:
            wspec = lambda shape: pl.BlockSpec(shape, fixed, pipeline_mode=pl.Buffered(1))
        else:
            wspec = lambda shape: pl.BlockSpec(shape, fixed)
        return pl.pallas_call(
            _generator_kernel,
            out_shape=jax.ShapeDtypeStruct((Bp, Dp), jnp.float32),
            grid=(n_tiles,),
            in_specs=[
                pl.BlockSpec((TB, D), row),   # data_w_noise tile
                pl.BlockSpec((TB, D), row),   # mask tile
                wspec((2 * D, H)),            # w1
                wspec((1, H)),                # b1
                wspec((H, H)),                # w2
                wspec((1, H)),                # b2
                wspec((H, Dp)),               # w3
                wspec((1, Dp)),               # b3
            ],
            out_specs=pl.BlockSpec((TB, Dp), row),
            scratch_shapes=[pltpu.VMEM((TB, 2 * D), cdt)],
            compiler_params=pltpu.CompilerParams(
                dimension_semantics=("parallel",),
                vmem_limit_bytes=vmem_limit,
            ),
            cost_estimate=cost,
        )(data, msk, w1, b1, w2, b2, w3, b3)

    try:
        # Resident params never change block index -> single-buffer them (halves their
        # VMEM footprint; matters for large H under v7x's 64 MiB VMEM).
        out = run(True)
    except Exception:
        out = run(False)  # fallback if this JAX build rejects pl.Buffered(1)

    if Bp != B or Dp != D:
        out = out[:B, :D]
    return out


def init_params(key, input_dim, hidden_dim):
    """Deterministic synthetic init matching the PyTorch module's parameter shapes
    (nn.Linear(2D,H), nn.Linear(H,H), nn.Linear(H,D)), stored transposed as (in,out)."""
    k1, k2, k3, k4, k5, k6 = jax.random.split(key, 6)
    d2 = input_dim * 2
    s1 = 1.0 / jnp.sqrt(jnp.float32(d2))
    s2 = 1.0 / jnp.sqrt(jnp.float32(hidden_dim))
    return {
        "w1": jax.random.uniform(k1, (d2, hidden_dim), jnp.float32, -s1, s1),
        "b1": jax.random.uniform(k2, (1, hidden_dim), jnp.float32, -s1, s1),
        "w2": jax.random.uniform(k3, (hidden_dim, hidden_dim), jnp.float32, -s2, s2),
        "b2": jax.random.uniform(k4, (1, hidden_dim), jnp.float32, -s2, s2),
        "w3": jax.random.uniform(k5, (hidden_dim, input_dim), jnp.float32, -s2, s2),
        "b3": jax.random.uniform(k6, (1, input_dim), jnp.float32, -s2, s2),
    }


def _reference_forward(data_w_noise, mask, params):
    x = jnp.concatenate([data_w_noise, mask], axis=1).astype(jnp.float32)
    h1 = jnp.maximum(x @ params["w1"] + params["b1"], 0.0)
    h2 = jnp.maximum(h1 @ params["w2"] + params["b2"], 0.0)
    return jax.nn.sigmoid(h2 @ params["w3"] + params["b3"])


if __name__ == "__main__":
    B = 8          # batch
    D = 16         # input_dim (number of features)
    H = 32         # hidden_dim

    key = jax.random.PRNGKey(0)
    k_data, k_mask, k_params = jax.random.split(key, 3)

    data_w_noise = jax.random.normal(k_data, (B, D), jnp.float32)
    mask = (jax.random.uniform(k_mask, (B, D)) > 0.5).astype(jnp.float32)
    params = init_params(k_params, D, H)

    ref = _reference_forward(data_w_noise, mask, params)

    # fp32 path: bit-matches the reference.
    prepared = prepare_params(params, D, dtype=jnp.float32)
    out = jax.block_until_ready(generator_forward(data_w_noise, mask, prepared))
    assert out.shape == (B, D)
    assert jnp.allclose(out, ref, atol=1e-5, rtol=1e-5), "fp32 mismatch vs JAX reference"

    # bf16 weights/activations with f32 accumulation (halves HBM/VMEM traffic at real sizes).
    prepared_bf16 = prepare_params(params, D, dtype=jnp.bfloat16)
    out_bf16 = jax.block_until_ready(generator_forward(data_w_noise, mask, prepared_bf16))
    assert out_bf16.shape == (B, D)
    assert jnp.allclose(out_bf16, ref, atol=3e-2, rtol=3e-2), "bf16 mismatch vs JAX reference"

    print("KERNEL_OK")
</pallas_src>

<mosaic_0001>
module attributes {stable_mosaic.version = 11 : i64} {
  func.func @_generator_kernel(%arg0: i32, %arg1: memref<8x16xf32, #tpu.memory_space<vmem>>, %arg2: memref<8x16xf32, #tpu.memory_space<vmem>>, %arg3: memref<32x32xf32, #tpu.memory_space<vmem>>, %arg4: memref<1x32xf32, #tpu.memory_space<vmem>>, %arg5: memref<32x32xf32, #tpu.memory_space<vmem>>, %arg6: memref<1x32xf32, #tpu.memory_space<vmem>>, %arg7: memref<32x16xf32, #tpu.memory_space<vmem>>, %arg8: memref<1x16xf32, #tpu.memory_space<vmem>>, %arg9: memref<8x16xf32, #tpu.memory_space<vmem>>, %arg10: memref<8x32xf32, #tpu.memory_space<vmem>>) attributes {dimension_semantics = [#tpu.dimension_semantics<parallel>], iteration_bounds = array<i64: 1>, scalar_prefetch = 0 : i64, scratch_operands = 1 : i64, tpu.core_type = #tpu.core_type<tc>, window_params = [{transform_indices = @transform_0, window_bounds = array<i64: 8, 16>}, {transform_indices = @transform_1, window_bounds = array<i64: 8, 16>}, {pipeline_mode = #tpu.pipeline_mode<synchronous>, transform_indices = @transform_2, window_bounds = array<i64: 32, 32>}, {pipeline_mode = #tpu.pipeline_mode<synchronous>, transform_indices = @transform_3, window_bounds = array<i64: 1, 32>}, {pipeline_mode = #tpu.pipeline_mode<synchronous>, transform_indices = @transform_4, window_bounds = array<i64: 32, 32>}, {pipeline_mode = #tpu.pipeline_mode<synchronous>, transform_indices = @transform_5, window_bounds = array<i64: 1, 32>}, {pipeline_mode = #tpu.pipeline_mode<synchronous>, transform_indices = @transform_6, window_bounds = array<i64: 32, 16>}, {pipeline_mode = #tpu.pipeline_mode<synchronous>, transform_indices = @transform_7, window_bounds = array<i64: 1, 16>}, {transform_indices = @transform_8, window_bounds = array<i64: 8, 16>}]} {
    %c0 = arith.constant 0 : index
    %c0_0 = arith.constant 0 : index
    %0 = vector.load %arg1[%c0, %c0_0] : memref<8x16xf32, #tpu.memory_space<vmem>>, vector<8x16xf32>
    %c0_1 = arith.constant 0 : index
    %c0_2 = arith.constant 0 : index
    %1 = vector.load %arg10[%c0_1, %c0_2] : memref<8x32xf32, #tpu.memory_space<vmem>>, vector<8x16xf32>
    tpu.vector_store %arg10[%c0_1, %c0_2], %0 {strides = array<i32>} : memref<8x32xf32, #tpu.memory_space<vmem>>, vector<8x16xf32>,
    %c0_3 = arith.constant 0 : index
    %c0_4 = arith.constant 0 : index
    %2 = vector.load %arg2[%c0_3, %c0_4] : memref<8x16xf32, #tpu.memory_space<vmem>>, vector<8x16xf32>
    %c0_5 = arith.constant 0 : index
    %c16 = arith.constant 16 : index
    %3 = vector.load %arg10[%c0_5, %c16] : memref<8x32xf32, #tpu.memory_space<vmem>>, vector<8x16xf32>
    tpu.vector_store %arg10[%c0_5, %c16], %2 {strides = array<i32>} : memref<8x32xf32, #tpu.memory_space<vmem>>, vector<8x16xf32>,
    %c0_6 = arith.constant 0 : index
    %c0_7 = arith.constant 0 : index
    %4 = vector.load %arg10[%c0_6, %c0_7] : memref<8x32xf32, #tpu.memory_space<vmem>>, vector<8x32xf32>
    %c0_8 = arith.constant 0 : index
    %c0_9 = arith.constant 0 : index
    %5 = vector.load %arg3[%c0_8, %c0_9] : memref<32x32xf32, #tpu.memory_space<vmem>>, vector<32x32xf32>
    %cst = arith.constant dense<0.000000e+00> : vector<8x32xf32>
    %6 = tpu.matmul %4, %5, %cst {dimension_numbers = #tpu.dot_dimension_numbers<[1], [0], [0], [1], [0, 0, 1, 1], [], []>} : vector<8x32xf32>, vector<32x32xf32>, vector<8x32xf32> -> vector<8x32xf32>
    %c0_10 = arith.constant 0 : index
    %c0_11 = arith.constant 0 : index
    %7 = vector.load %arg4[%c0_10, %c0_11] : memref<1x32xf32, #tpu.memory_space<vmem>>, vector<1x32xf32>
    %8 = vector.broadcast %7 : vector<1x32xf32> to vector<8x32xf32>
    %9 = arith.addf %6, %8 : vector<8x32xf32>
    %cst_12 = arith.constant 0.000000e+00 : f32
    %10 = vector.broadcast %cst_12 : f32 to vector<8x32xf32>
    %11 = arith.maximumf %9, %10 : vector<8x32xf32>
    %c0_13 = arith.constant 0 : index
    %c0_14 = arith.constant 0 : index
    %12 = vector.load %arg5[%c0_13, %c0_14] : memref<32x32xf32, #tpu.memory_space<vmem>>, vector<32x32xf32>
    %cst_15 = arith.constant dense<0.000000e+00> : vector<8x32xf32>
    %13 = tpu.matmul %11, %12, %cst_15 {dimension_numbers = #tpu.dot_dimension_numbers<[1], [0], [0], [1], [0, 0, 1, 1], [], []>} : vector<8x32xf32>, vector<32x32xf32>, vector<8x32xf32> -> vector<8x32xf32>
    %c0_16 = arith.constant 0 : index
    %c0_17 = arith.constant 0 : index
    %14 = vector.load %arg6[%c0_16, %c0_17] : memref<1x32xf32, #tpu.memory_space<vmem>>, vector<1x32xf32>
    %15 = vector.broadcast %14 : vector<1x32xf32> to vector<8x32xf32>
    %16 = arith.addf %13, %15 : vector<8x32xf32>
    %cst_18 = arith.constant 0.000000e+00 : f32
    %17 = vector.broadcast %cst_18 : f32 to vector<8x32xf32>
    %18 = arith.maximumf %16, %17 : vector<8x32xf32>
    %c0_19 = arith.constant 0 : index
    %c0_20 = arith.constant 0 : index
    %19 = vector.load %arg7[%c0_19, %c0_20] : memref<32x16xf32, #tpu.memory_space<vmem>>, vector<32x16xf32>
    %cst_21 = arith.constant dense<0.000000e+00> : vector<8x16xf32>
    %20 = tpu.matmul %18, %19, %cst_21 {dimension_numbers = #tpu.dot_dimension_numbers<[1], [0], [0], [1], [0, 0, 1, 1], [], []>} : vector<8x32xf32>, vector<32x16xf32>, vector<8x16xf32> -> vector<8x16xf32>
    %c0_22 = arith.constant 0 : index
    %c0_23 = arith.constant 0 : index
    %21 = vector.load %arg8[%c0_22, %c0_23] : memref<1x16xf32, #tpu.memory_space<vmem>>, vector<1x16xf32>
    %22 = vector.broadcast %21 : vector<1x16xf32> to vector<8x16xf32>
    %23 = arith.addf %20, %22 : vector<8x16xf32>
    %24 = arith.negf %23 : vector<8x16xf32>
    %25 = math.exp %24 : vector<8x16xf32>
    %cst_24 = arith.constant 1.000000e+00 : f32
    %26 = vector.broadcast %cst_24 : f32 to vector<8x16xf32>
    %27 = arith.addf %26, %25 : vector<8x16xf32>
    %28 = arith.divf %26, %27 : vector<8x16xf32>
    %c0_25 = arith.constant 0 : index
    %c0_26 = arith.constant 0 : index
    %29 = vector.load %arg9[%c0_25, %c0_26] : memref<8x16xf32, #tpu.memory_space<vmem>>, vector<8x16xf32>
    tpu.vector_store %arg9[%c0_25, %c0_26], %28 {strides = array<i32>} : memref<8x16xf32, #tpu.memory_space<vmem>>, vector<8x16xf32>,
    return
  }
  func.func @transform_0(%arg0: i32) -> (i32, i32) {
    %c0_i32 = arith.constant 0 : i32
    %c0_i32_0 = arith.constant 0 : i32
    return %arg0, %c0_i32 : i32, i32
  }
  func.func @transform_1(%arg0: i32) -> (i32, i32) {
    %c0_i32 = arith.constant 0 : i32
    %c0_i32_0 = arith.constant 0 : i32
    return %arg0, %c0_i32 : i32, i32
  }
  func.func @transform_2(%arg0: i32) -> (i32, i32) {
    %c0_i32 = arith.constant 0 : i32
    %c0_i32_0 = arith.constant 0 : i32
    %c0_i32_1 = arith.constant 0 : i32
    return %c0_i32, %c0_i32_0 : i32, i32
  }
  func.func @transform_3(%arg0: i32) -> (i32, i32) {
    %c0_i32 = arith.constant 0 : i32
    %c0_i32_0 = arith.constant 0 : i32
    %c0_i32_1 = arith.constant 0 : i32
    return %c0_i32, %c0_i32_0 : i32, i32
  }
  func.func @transform_4(%arg0: i32) -> (i32, i32) {
    %c0_i32 = arith.constant 0 : i32
    %c0_i32_0 = arith.constant 0 : i32
    %c0_i32_1 = arith.constant 0 : i32
    return %c0_i32, %c0_i32_0 : i32, i32
  }
  func.func @transform_5(%arg0: i32) -> (i32, i32) {
    %c0_i32 = arith.constant 0 : i32
    %c0_i32_0 = arith.constant 0 : i32
    %c0_i32_1 = arith.constant 0 : i32
    return %c0_i32, %c0_i32_0 : i32, i32
  }
  func.func @transform_6(%arg0: i32) -> (i32, i32) {
    %c0_i32 = arith.constant 0 : i32
    %c0_i32_0 = arith.constant 0 : i32
    %c0_i32_1 = arith.constant 0 : i32
    return %c0_i32, %c0_i32_0 : i32, i32
  }
  func.func @transform_7(%arg0: i32) -> (i32, i32) {
    %c0_i32 = arith.constant 0 : i32
    %c0_i32_0 = arith.constant 0 : i32
    %c0_i32_1 = arith.constant 0 : i32
    return %c0_i32, %c0_i32_0 : i32, i32
  }
  func.func @transform_8(%arg0: i32) -> (i32, i32) {
    %c0_i32 = arith.constant 0 : i32
    %c0_i32_0 = arith.constant 0 : i32
    return %arg0, %c0_i32 : i32, i32
  }
}

module attributes {stable_mosaic.version = 11 : i64} {
  func.func @_generator_kernel(%arg0: i32, %arg1: memref<8x16xf32, #tpu.memory_space<vmem>>, %arg2: memref<8x16xf32, #tpu.memory_space<vmem>>, %arg3: memref<32x32xf32, #tpu.memory_space<vmem>>, %arg4: memref<1x32xf32, #tpu.memory_space<vmem>>, %arg5: memref<32x32xf32, #tpu.memory_space<vmem>>, %arg6: memref<1x32xf32, #tpu.memory_space<vmem>>, %arg7: memref<32x16xf32, #tpu.memory_space<vmem>>, %arg8: memref<1x16xf32, #tpu.memory_space<vmem>>, %arg9: memref<8x16xf32, #tpu.memory_space<vmem>>, %arg10: memref<8x32xf32, #tpu.memory_space<vmem>>) attributes {dimension_semantics = [#tpu.dimension_semantics<parallel>], iteration_bounds = array<i64: 1>, scalar_prefetch = 0 : i64, scratch_operands = 1 : i64, tpu.core_type = #tpu.core_type<tc>, window_params = [{transform_indices = @transform_0, window_bounds = array<i64: 8, 16>}, {transform_indices = @transform_1, window_bounds = array<i64: 8, 16>}, {pipeline_mode = #tpu.pipeline_mode<synchronous>, transform_indices = @transform_2, window_bounds = array<i64: 32, 32>}, {pipeline_mode = #tpu.pipeline_mode<synchronous>, transform_indices = @transform_3, window_bounds = array<i64: 1, 32>}, {pipeline_mode = #tpu.pipeline_mode<synchronous>, transform_indices = @transform_4, window_bounds = array<i64: 32, 32>}, {pipeline_mode = #tpu.pipeline_mode<synchronous>, transform_indices = @transform_5, window_bounds = array<i64: 1, 32>}, {pipeline_mode = #tpu.pipeline_mode<synchronous>, transform_indices = @transform_6, window_bounds = array<i64: 32, 16>}, {pipeline_mode = #tpu.pipeline_mode<synchronous>, transform_indices = @transform_7, window_bounds = array<i64: 1, 16>}, {transform_indices = @transform_8, window_bounds = array<i64: 8, 16>}]} {
    %c0 = arith.constant 0 : index
    %c0_0 = arith.constant 0 : index
    %0 = vector.load %arg1[%c0, %c0_0] : memref<8x16xf32, #tpu.memory_space<vmem>>, vector<8x16xf32>
    %c0_1 = arith.constant 0 : index
    %c0_2 = arith.constant 0 : index
    %1 = vector.load %arg10[%c0_1, %c0_2] : memref<8x32xf32, #tpu.memory_space<vmem>>, vector<8x16xf32>
    tpu.vector_store %arg10[%c0_1, %c0_2], %0 {strides = array<i32>} : memref<8x32xf32, #tpu.memory_space<vmem>>, vector<8x16xf32>,
    %c0_3 = arith.constant 0 : index
    %c0_4 = arith.constant 0 : index
    %2 = vector.load %arg2[%c0_3, %c0_4] : memref<8x16xf32, #tpu.memory_space<vmem>>, vector<8x16xf32>
    %c0_5 = arith.constant 0 : index
    %c16 = arith.constant 16 : index
    %3 = vector.load %arg10[%c0_5, %c16] : memref<8x32xf32, #tpu.memory_space<vmem>>, vector<8x16xf32>
    tpu.vector_store %arg10[%c0_5, %c16], %2 {strides = array<i32>} : memref<8x32xf32, #tpu.memory_space<vmem>>, vector<8x16xf32>,
    %c0_6 = arith.constant 0 : index
    %c0_7 = arith.constant 0 : index
    %4 = vector.load %arg10[%c0_6, %c0_7] : memref<8x32xf32, #tpu.memory_space<vmem>>, vector<8x32xf32>
    %c0_8 = arith.constant 0 : index
    %c0_9 = arith.constant 0 : index
    %5 = vector.load %arg3[%c0_8, %c0_9] : memref<32x32xf32, #tpu.memory_space<vmem>>, vector<32x32xf32>
    %cst = arith.constant dense<0.000000e+00> : vector<8x32xf32>
    %6 = tpu.matmul %4, %5, %cst {dimension_numbers = #tpu.dot_dimension_numbers<[1], [0], [0], [1], [0, 0, 1, 1], [], []>} : vector<8x32xf32>, vector<32x32xf32>, vector<8x32xf32> -> vector<8x32xf32>
    %c0_10 = arith.constant 0 : index
    %c0_11 = arith.constant 0 : index
    %7 = vector.load %arg4[%c0_10, %c0_11] : memref<1x32xf32, #tpu.memory_space<vmem>>, vector<1x32xf32>
    %8 = vector.broadcast %7 : vector<1x32xf32> to vector<8x32xf32>
    %9 = arith.addf %6, %8 : vector<8x32xf32>
    %cst_12 = arith.constant 0.000000e+00 : f32
    %10 = vector.broadcast %cst_12 : f32 to vector<8x32xf32>
    %11 = arith.maximumf %9, %10 : vector<8x32xf32>
    %c0_13 = arith.constant 0 : index
    %c0_14 = arith.constant 0 : index
    %12 = vector.load %arg5[%c0_13, %c0_14] : memref<32x32xf32, #tpu.memory_space<vmem>>, vector<32x32xf32>
    %cst_15 = arith.constant dense<0.000000e+00> : vector<8x32xf32>
    %13 = tpu.matmul %11, %12, %cst_15 {dimension_numbers = #tpu.dot_dimension_numbers<[1], [0], [0], [1], [0, 0, 1, 1], [], []>} : vector<8x32xf32>, vector<32x32xf32>, vector<8x32xf32> -> vector<8x32xf32>
    %c0_16 = arith.constant 0 : index
    %c0_17 = arith.constant 0 : index
    %14 = vector.load %arg6[%c0_16, %c0_17] : memref<1x32xf32, #tpu.memory_space<vmem>>, vector<1x32xf32>
    %15 = vector.broadcast %14 : vector<1x32xf32> to vector<8x32xf32>
    %16 = arith.addf %13, %15 : vector<8x32xf32>
    %cst_18 = arith.constant 0.000000e+00 : f32
    %17 = vector.broadcast %cst_18 : f32 to vector<8x32xf32>
    %18 = arith.maximumf %16, %17 : vector<8x32xf32>
    %c0_19 = arith.constant 0 : index
    %c0_20 = arith.constant 0 : index
    %19 = vector.load %arg7[%c0_19, %c0_20] : memref<32x16xf32, #tpu.memory_space<vmem>>, vector<32x16xf32>
    %cst_21 = arith.constant dense<0.000000e+00> : vector<8x16xf32>
    %20 = tpu.matmul %18, %19, %cst_21 {dimension_numbers = #tpu.dot_dimension_numbers<[1], [0], [0], [1], [0, 0, 1, 1], [], []>} : vector<8x32xf32>, vector<32x16xf32>, vector<8x16xf32> -> vector<8x16xf32>
    %c0_22 = arith.constant 0 : index
    %c0_23 = arith.constant 0 : index
    %21 = vector.load %arg8[%c0_22, %c0_23] : memref<1x16xf32, #tpu.memory_space<vmem>>, vector<1x16xf32>
    %22 = vector.broadcast %21 : vector<1x16xf32> to vector<8x16xf32>
    %23 = arith.addf %20, %22 : vector<8x16xf32>
    %24 = arith.negf %23 : vector<8x16xf32>
    %25 = math.exp %24 : vector<8x16xf32>
    %cst_24 = arith.constant 1.000000e+00 : f32
    %26 = vector.broadcast %cst_24 : f32 to vector<8x16xf32>
    %27 = arith.addf %26, %25 : vector<8x16xf32>
    %28 = arith.divf %26, %27 : vector<8x16xf32>
    %c0_25 = arith.constant 0 : index
    %c0_26 = arith.constant 0 : index
    %29 = vector.load %arg9[%c0_25, %c0_26] : memref<8x16xf32, #tpu.memory_space<vmem>>, vector<8x16xf32>
    tpu.vector_store %arg9[%c0_25, %c0_26], %28 {strides = array<i32>} : memref<8x16xf32, #tpu.memory_space<vmem>>, vector<8x16xf32>,
    return
  }
  func.func @transform_0(%arg0: i32) -> (i32, i32) {
    %c0_i32 = arith.constant 0 : i32
    %c0_i32_0 = arith.constant 0 : i32
    return %arg0, %c0_i32 : i32, i32
  }
  func.func @transform_1(%arg0: i32) -> (i32, i32) {
    %c0_i32 = arith.constant 0 : i32
    %c0_i32_0 = arith.constant 0 : i32
    return %arg0, %c0_i32 : i32, i32
  }
  func.func @transform_2(%arg0: i32) -> (i32, i32) {
    %c0_i32 = arith.constant 0 : i32
    %c0_i32_0 = arith.constant 0 : i32
    %c0_i32_1 = arith.constant 0 : i32
    return %c0_i32, %c0_i32_0 : i32, i32
  }
  func.func @transform_3(%arg0: i32) -> (i32, i32) {
    %c0_i32 = arith.constant 0 : i32
    %c0_i32_0 = arith.constant 0 : i32
    %c0_i32_1 = arith.constant 0 : i32
    return %c0_i32, %c0_i32_0 : i32, i32
  }
  func.func @transform_4(%arg0: i32) -> (i32, i32) {
    %c0_i32 = arith.constant 0 : i32
    %c0_i32_0 = arith.constant 0 : i32
    %c0_i32_1 = arith.constant 0 : i32
    return %c0_i32, %c0_i32_0 : i32, i32
  }
  func.func @transform_5(%arg0: i32) -> (i32, i32) {
    %c0_i32 = arith.constant 0 : i32
    %c0_i32_0 = arith.constant 0 : i32
    %c0_i32_1 = arith.constant 0 : i32
    return %c0_i32, %c0_i32_0 : i32, i32
  }
  func.func @transform_6(%arg0: i32) -> (i32, i32) {
    %c0_i32 = arith.constant 0 : i32
    %c0_i32_0 = arith.constant 0 : i32
    %c0_i32_1 = arith.constant 0 : i32
    return %c0_i32, %c0_i32_0 : i32, i32
  }
  func.func @transform_7(%arg0: i32) -> (i32, i32) {
    %c0_i32 = arith.constant 0 : i32
    %c0_i32_0 = arith.constant 0 : i32
    %c0_i32_1 = arith.constant 0 : i32
    return %c0_i32, %c0_i32_0 : i32, i32
  }
  func.func @transform_8(%arg0: i32) -> (i32, i32) {
    %c0_i32 = arith.constant 0 : i32
    %c0_i32_0 = arith.constant 0 : i32
    return %arg0, %c0_i32 : i32, i32
  }
}

</mosaic_0001>

<bundles_post_ra>
// kernel: tpu_custom_call.1
= control target key start
LH: loop header
LB: loop body
LE: loop exit
PB: predicated region body
PF: predicated region fallthrough
CT: control target
= control target key end

     0   :  { %13 = vsyncpa [#allocation4], 0  ;;  %s589_s0 = inlined_call_operand.vmem [shape: f32[8,16], index: 0, kind: input, shape index: {}]   ;;  %s590_s1 = inlined_call_operand.vmem [shape: f32[8,16], index: 1, kind: input, shape index: {}]   ;;  %s591_s2 = inlined_call_operand.vmem [shape: f32[32,32], index: 2, kind: input, shape index: {}]   ;;  %s592_s3 = inlined_call_operand.vmem [shape: f32[1,32], index: 3, kind: input, shape index: {}]   ;;  %s593_s4 = inlined_call_operand.hbm [shape: f32[32,32], index: 4, kind: input, shape index: {}]   ;;  %s594_s5 = inlined_call_operand.vmem [shape: f32[1,32], index: 5, kind: input, shape index: {}]   ;;  %s595_s6 = inlined_call_operand.vmem [shape: f32[32,16], index: 6, kind: input, shape index: {}]   ;;  %s596_s7 = inlined_call_operand.vmem [shape: f32[1,16], index: 7, kind: input, shape index: {}]   ;;  %s597_s8 = inlined_call_operand.hbm [shape: f32[8,16], index: 8, kind: output, shape index: {}]  }
   0x1   :  { %14 = vsyncpa [#allocation5], 0  ;;  %s465_s27 = smov [#allocation3]   ;;  %s417_s9 = scalar_lea.hbm %s593_s4, 512 }
   0x2   :  { %s28_s28 = sshll.u32 %s465_s27, 4  ;;  %p418_p0 = scmp.ne.s32.totalorder %s593_s4, %s417_s9  ;;  %s29_s28 = int_to_ptr.vmem [resolvable:$true] %s28_s28 }
   0x3   :  { %p421_p1 = scmp.lt.u32.totalorder %s417_s9, %s593_s4 }
   0x5   :  { %p423_p2 = pnand %p421_p1, %p418_p0 }
   0x7   :  { %426 = shalt.err (!%p423_p2)
}
   0x8   :  { %s427_s14 = scalar_lea.vmem %s29_s28, 512  ;;  %p432_p4 = scmp.lt.s32.totalorder %s29_s28, %s29_s28 }
   0x9   :  { %p428_p3 = scmp.ne.s32.totalorder %s29_s28, %s427_s14  ;;  %p433_p5 = scmp.lt.s32.totalorder %s427_s14, %s427_s14 }
   0xb   :  { %p434_p6 = por %p433_p5, %p432_p4 }
   0xd   :  { %p435_p7 = pnand %p434_p6, %p428_p3 }
   0xf   :  { %438 = shalt.err (!%p435_p7)
}
  0x10   :  { %s466_s15 = smov 128   ;;  %s467_s16 = smov 8  }
  0x11   :  { %34 = dma.hbm_to_vmem [thread:$0]  %s593_s4, 512, %s29_s28, [#allocation4], %s466_s15, %s466_s15, %s467_s16  }
  0x12   :  { %461 = dma.done.wait [#allocation4], 512  }
  0x13   :  { %462 = vsyncadd [#allocation4], 4294966784  ;;  %v468_v0 = vmov 0.0|0.0   ;;  %vm469_vm0 = vmmov 0   ;;  %v470_v1 = vmov 0.0   ;;  %vm45_vm1 = vcmask 130048  }
  0x14   :  { %387 = vmatprep.subr.bf16.mxu0 %v468_v0  ;;  %393 = vmatprep.subr.bf16.mxu1 %v468_v0  ;;  %v47_v2 = vld [vmem:[%s590_s1] sm:$0xff]  ;;  %s471_s24 = smov 16   ;;  %v56_v5 = vld [vmem:[%s591_s2 + $0x8] sm:$0xff]  ;;  %v57_v6 = vld [vmem:[%s591_s2 + $0x10] sm:$0xff]  ;;  %vm52_vm2 = vcmask 261248   ;;  %vm66_vm3 = vcmask 261120  }
  0x15   :  { %362 = vmatprep.mubr.msk.f32.mxu0 %vm469_vm0, %v470_v1  ;;  %373 = vmatprep.mubr.msk.f32.mxu1 %vm469_vm0, %v470_v1  ;;  %v44_v3 = vld [vmem:[%s589_s0] sm:$0xff]  ;;  %v58_v7 = vld [vmem:[%s591_s2 + $0x18] sm:$0xff]  ;;  %v141_v9 = vld [vmem:[#allocation3] sm:$0xff] }
  0x16   :  { %v55_v4 = vld [vmem:[%s591_s2] sm:$0xff]  ;;  %49 = vrot.lane.b32.xlu0 %v47_v2, %s471_s24  ;;  %46 = vst.msk [vmem:[#allocation2] sm:$0xff] %vm45_vm1, %v44_v3  ;;  %v142_v10 = vld [vmem:[#allocation3 + $0x8] sm:$0xff]  ;;  %v391_v12 = vpack.c.bf16 %v58_v7, %v57_v6  ;;  %v143_v15 = vld [vmem:[#allocation3 + $0x10] sm:$0xff] }
  0x17   :  { %v388_v8 = vpack.c.bf16 %v56_v5, %v55_v4  ;;  %v394_v11 = vpack.c.bf16 %v142_v10, %v141_v9  ;;  %v144_v16 = vld [vmem:[#allocation3 + $0x18] sm:$0xff]  ;;  %v227_v19 = vld [vmem:[%s595_s6 + $0x8] sm:$0xff]  ;;  %v228_v26 = vld [vmem:[%s595_s6 + $0x10] sm:$0xff] }
  0x18   :  { %v397_v17 = vpack.c.bf16 %v144_v16, %v143_v15  ;;  %v226_v18 = vld [vmem:[%s595_s6] sm:$0xff]  ;;  %v229_v27 = vld [vmem:[%s595_s6 + $0x18] sm:$0xff]  ;;  %s472_s6 = smov [#allocation6]  }
  0x19   :  { %389 = vmatpush3.bf16.msra.mxu0 %v388_v8  ;;  %395 = vmatpush3.bf16.msra.mxu1 %v394_v11  ;;  %v400_v20 = vpack.c.bf16 %v227_v19, %v226_v18  ;;  %v332_v21 = vld [vmem:[%s592_s3] ss:$0 sm:$0xff]  ;;  %v403_v28 = vpack.c.bf16 %v229_v27, %v228_v26 }
  0x1a   :  { %390 = vmatprep.subr.bf16.mxu0 %v468_v0  ;;  %396 = vmatprep.subr.bf16.mxu1 %v468_v0  ;;  %v334_v29 = vld [vmem:[%s594_s5] ss:$0 sm:$0xff]  ;;  %s323_s5 = sshll.u32 %s472_s6, 4  ;;  %s324_s5 = int_to_ptr.vmem [resolvable:$true] %s323_s5 }
  0x1b   :  { %v336_v34 = vld [vmem:[%s596_s7] ss:$0 sm:$0xff]  ;;  %s439_s19 = scalar_lea.vmem %s324_s5, 128  ;;  %p444_p9 = scmp.lt.s32.totalorder %s324_s5, %s324_s5 }
  0x1c   :  { %p440_p8 = scmp.ne.s32.totalorder %s324_s5, %s439_s19  ;;  %p445_p10 = scmp.lt.s32.totalorder %s439_s19, %s439_s19 }
  0x1d   :  { %392 = vmatpush3.bf16.msra.mxu0 %v391_v12  ;;  %398 = vmatpush3.bf16.msra.mxu1 %v397_v17 }
  0x1e   :  { %399 = vmatprep.subr.bf16.mxu0 %v468_v0  ;;  %p446_p11 = por %p445_p10, %p444_p9 }
  0x20   :  { %p447_p12 = pnand %p446_p11, %p440_p8 }
  0x88   :  { %v50_v13 = vpop.permute.xlu0 %49 }
  0x89   :  { %53 = vst.msk [vmem:[#allocation2] sm:$0xff] %vm52_vm2, %v50_v13 }
  0x90   :  { %v54_v14 = vld [vmem:[#allocation2] sm:$0xff] }
  0x91   :  { %363 = vmatmul.mubr.msk.f32.vlgmr.msra.gmra.mrb[0].mxu0 %vm66_vm3, %v54_v14 }
  0x92   :  { %384 = vmatprep.mubr.msk.f32.mxu0 %vm469_vm0, %v470_v1  ;;  %401 = vmatpush3.bf16.msra.mxu0 %v400_v20 }
  0x93   :  { %402 = vmatprep.subr.bf16.mxu0 %v468_v0 }
  0x96   :  { %404 = vmatpush3.bf16.msra.mxu0 %v403_v28 }
 0x164   :  { %v136_v22 = vpop.f32.mrb[0].mxu0 }
 0x165   :  { %v137_v23 = vadd.f32 %v332_v21, %v136_v22  ;;  %v364_v24 = vpop.f32.mrb[1].mxu0 }
 0x167   :  { %v140_v25 = vmax.f32 %v137_v23, 0.0 }
 0x169   :  { %374 = vmatmul.mubr.msk.f32.vlgmr.msra.gmra.mrb[0].mxu1 %vm66_vm3, %v140_v25 }
 0x23c   :  { %v221_v30 = vpop.f32.mrb[0].mxu1 }
 0x23d   :  { %v222_v31 = vadd.f32 %v334_v29, %v221_v30  ;;  %v375_v32 = vpop.f32.mrb[1].mxu1 }
 0x23f   :  { %v225_v33 = vmax.f32 %v222_v31, 0.0 }
 0x241   :  { %385 = vmatmul.mubr.msk.f32.vlgmr.msra.gmra.mrb[2].mxu0 %vm66_vm3, %v225_v33 }
 0x314   :  { %v306_v35 = vpop.f32.mrb[2].mxu0 }
 0x315   :  { %v307_v36 = vadd.f32 %v336_v34, %v306_v35  ;;  %v386_v37 = vpop.f32.mrb[3].mxu0 }
 0x317   :  { %v338_v38 = vmul.f32 -1.442695, %v307_v36 }
 0x319   :  { %413 = vpow2.f32 %v338_v38 }
 0x323   :  { %v414_v39 = vpop.eup %413 }
 0x324   :  { %v313_v40 = vadd.f32 1.0, %v414_v39 }
 0x326   :  { %415 = vrcp.f32 %v313_v40 }
 0x330   :  { %v416_v41 = vpop.eup %415 }
 0x331   :  { %316 = vst.msk [vmem:[#allocation6] sm:$0xff] %vm45_vm1, %v416_v41 }
 0x332   :  { %450 = shalt.err (!%p447_p12)
}
 0x333   :  { %s451_s21 = scalar_lea.hbm %s597_s8, 128 }
 0x334   :  { %p452_p13 = scmp.ne.s32.totalorder %s597_s8, %s451_s21  ;;  %p455_p0 = scmp.lt.u32.totalorder %s451_s21, %s597_s8 }
 0x336   :  { %p457_p1 = pnand %p455_p0, %p452_p13 }
 0x338   :  { %460 = shalt.err (!%p457_p1)
}
 0x339   :  { %326 = dma.vmem_to_hbm [thread:$0]  %s324_s5, 128, %s597_s8, [#allocation5]  }
 0x33a   :  { %463 = dma.done.wait [#allocation5], 128  }
 0x33b   :  { %464 = vsyncadd [#allocation5], 4294967168 }
 0x33c   :  { %330 = vsyncpa [#allocation4], 1 }
 0x33d   :  { %331 = vsyncpa [#allocation5], 1 }

// kernel: tpu_custom_call.1
= control target key start
LH: loop header
LB: loop body
LE: loop exit
PB: predicated region body
PF: predicated region fallthrough
CT: control target
= control target key end

     0   :  { %13 = vsyncpa [#allocation4], 0  ;;  %s589_s0 = inlined_call_operand.vmem [shape: f32[8,16], index: 0, kind: input, shape index: {}]   ;;  %s590_s1 = inlined_call_operand.vmem [shape: f32[8,16], index: 1, kind: input, shape index: {}]   ;;  %s591_s2 = inlined_call_operand.vmem [shape: f32[32,32], index: 2, kind: input, shape index: {}]   ;;  %s592_s3 = inlined_call_operand.vmem [shape: f32[1,32], index: 3, kind: input, shape index: {}]   ;;  %s593_s4 = inlined_call_operand.hbm [shape: f32[32,32], index: 4, kind: input, shape index: {}]   ;;  %s594_s5 = inlined_call_operand.vmem [shape: f32[1,32], index: 5, kind: input, shape index: {}]   ;;  %s595_s6 = inlined_call_operand.vmem [shape: f32[32,16], index: 6, kind: input, shape index: {}]   ;;  %s596_s7 = inlined_call_operand.vmem [shape: f32[1,16], index: 7, kind: input, shape index: {}]   ;;  %s597_s8 = inlined_call_operand.hbm [shape: f32[8,16], index: 8, kind: output, shape index: {}]  }
   0x1   :  { %14 = vsyncpa [#allocation5], 0  ;;  %s465_s27 = smov [#allocation3]   ;;  %s417_s9 = scalar_lea.hbm %s593_s4, 512 }
   0x2   :  { %s28_s28 = sshll.u32 %s465_s27, 4  ;;  %p418_p0 = scmp.ne.s32.totalorder %s593_s4, %s417_s9  ;;  %s29_s28 = int_to_ptr.vmem [resolvable:$true] %s28_s28 }
   0x3   :  { %p421_p1 = scmp.lt.u32.totalorder %s417_s9, %s593_s4 }
   0x5   :  { %p423_p2 = pnand %p421_p1, %p418_p0 }
   0x7   :  { %426 = shalt.err (!%p423_p2)
}
   0x8   :  { %s427_s14 = scalar_lea.vmem %s29_s28, 512  ;;  %p432_p4 = scmp.lt.s32.totalorder %s29_s28, %s29_s28 }
   0x9   :  { %p428_p3 = scmp.ne.s32.totalorder %s29_s28, %s427_s14  ;;  %p433_p5 = scmp.lt.s32.totalorder %s427_s14, %s427_s14 }
   0xb   :  { %p434_p6 = por %p433_p5, %p432_p4 }
   0xd   :  { %p435_p7 = pnand %p434_p6, %p428_p3 }
   0xf   :  { %438 = shalt.err (!%p435_p7)
}
  0x10   :  { %s466_s15 = smov 128   ;;  %s467_s16 = smov 8  }
  0x11   :  { %34 = dma.hbm_to_vmem [thread:$0]  %s593_s4, 512, %s29_s28, [#allocation4], %s466_s15, %s466_s15, %s467_s16  }
  0x12   :  { %461 = dma.done.wait [#allocation4], 512  }
  0x13   :  { %462 = vsyncadd [#allocation4], 4294966784  ;;  %v468_v0 = vmov 0.0|0.0   ;;  %vm469_vm0 = vmmov 0   ;;  %v470_v1 = vmov 0.0   ;;  %vm45_vm1 = vcmask 130048  }
  0x14   :  { %387 = vmatprep.subr.bf16.mxu0 %v468_v0  ;;  %393 = vmatprep.subr.bf16.mxu1 %v468_v0  ;;  %v47_v2 = vld [vmem:[%s590_s1] sm:$0xff]  ;;  %s471_s24 = smov 16   ;;  %v56_v5 = vld [vmem:[%s591_s2 + $0x8] sm:$0xff]  ;;  %v57_v6 = vld [vmem:[%s591_s2 + $0x10] sm:$0xff]  ;;  %vm52_vm2 = vcmask 261248   ;;  %vm66_vm3 = vcmask 261120  }
  0x15   :  { %362 = vmatprep.mubr.msk.f32.mxu0 %vm469_vm0, %v470_v1  ;;  %373 = vmatprep.mubr.msk.f32.mxu1 %vm469_vm0, %v470_v1  ;;  %v44_v3 = vld [vmem:[%s589_s0] sm:$0xff]  ;;  %v58_v7 = vld [vmem:[%s591_s2 + $0x18] sm:$0xff]  ;;  %v141_v9 = vld [vmem:[#allocation3] sm:$0xff] }
  0x16   :  { %v55_v4 = vld [vmem:[%s591_s2] sm:$0xff]  ;;  %49 = vrot.lane.b32.xlu0 %v47_v2, %s471_s24  ;;  %46 = vst.msk [vmem:[#allocation2] sm:$0xff] %vm45_vm1, %v44_v3  ;;  %v142_v10 = vld [vmem:[#allocation3 + $0x8] sm:$0xff]  ;;  %v391_v12 = vpack.c.bf16 %v58_v7, %v57_v6  ;;  %v143_v15 = vld [vmem:[#allocation3 + $0x10] sm:$0xff] }
  0x17   :  { %v388_v8 = vpack.c.bf16 %v56_v5, %v55_v4  ;;  %v394_v11 = vpack.c.bf16 %v142_v10, %v141_v9  ;;  %v144_v16 = vld [vmem:[#allocation3 + $0x18] sm:$0xff]  ;;  %v227_v19 = vld [vmem:[%s595_s6 + $0x8] sm:$0xff]  ;;  %v228_v26 = vld [vmem:[%s595_s6 + $0x10] sm:$0xff] }
  0x18   :  { %v397_v17 = vpack.c.bf16 %v144_v16, %v143_v15  ;;  %v226_v18 = vld [vmem:[%s595_s6] sm:$0xff]  ;;  %v229_v27 = vld [vmem:[%s595_s6 + $0x18] sm:$0xff]  ;;  %s472_s6 = smov [#allocation6]  }
  0x19   :  { %389 = vmatpush3.bf16.msra.mxu0 %v388_v8  ;;  %395 = vmatpush3.bf16.msra.mxu1 %v394_v11  ;;  %v400_v20 = vpack.c.bf16 %v227_v19, %v226_v18  ;;  %v332_v21 = vld [vmem:[%s592_s3] ss:$0 sm:$0xff]  ;;  %v403_v28 = vpack.c.bf16 %v229_v27, %v228_v26 }
  0x1a   :  { %390 = vmatprep.subr.bf16.mxu0 %v468_v0  ;;  %396 = vmatprep.subr.bf16.mxu1 %v468_v0  ;;  %v334_v29 = vld [vmem:[%s594_s5] ss:$0 sm:$0xff]  ;;  %s323_s5 = sshll.u32 %s472_s6, 4  ;;  %s324_s5 = int_to_ptr.vmem [resolvable:$true] %s323_s5 }
  0x1b   :  { %v336_v34 = vld [vmem:[%s596_s7] ss:$0 sm:$0xff]  ;;  %s439_s19 = scalar_lea.vmem %s324_s5, 128  ;;  %p444_p9 = scmp.lt.s32.totalorder %s324_s5, %s324_s5 }
  0x1c   :  { %p440_p8 = scmp.ne.s32.totalorder %s324_s5, %s439_s19  ;;  %p445_p10 = scmp.lt.s32.totalorder %s439_s19, %s439_s19 }
  0x1d   :  { %392 = vmatpush3.bf16.msra.mxu0 %v391_v12  ;;  %398 = vmatpush3.bf16.msra.mxu1 %v397_v17 }
  0x1e   :  { %399 = vmatprep.subr.bf16.mxu0 %v468_v0  ;;  %p446_p11 = por %p445_p10, %p444_p9 }
  0x20   :  { %p447_p12 = pnand %p446_p11, %p440_p8 }
  0x88   :  { %v50_v13 = vpop.permute.xlu0 %49 }
  0x89   :  { %53 = vst.msk [vmem:[#allocation2] sm:$0xff] %vm52_vm2, %v50_v13 }
  0x90   :  { %v54_v14 = vld [vmem:[#allocation2] sm:$0xff] }
  0x91   :  { %363 = vmatmul.mubr.msk.f32.vlgmr.msra.gmra.mrb[0].mxu0 %vm66_vm3, %v54_v14 }
  0x92   :  { %384 = vmatprep.mubr.msk.f32.mxu0 %vm469_vm0, %v470_v1  ;;  %401 = vmatpush3.bf16.msra.mxu0 %v400_v20 }
  0x93   :  { %402 = vmatprep.subr.bf16.mxu0 %v468_v0 }
  0x96   :  { %404 = vmatpush3.bf16.msra.mxu0 %v403_v28 }
 0x164   :  { %v136_v22 = vpop.f32.mrb[0].mxu0 }
 0x165   :  { %v137_v23 = vadd.f32 %v332_v21, %v136_v22  ;;  %v364_v24 = vpop.f32.mrb[1].mxu0 }
 0x167   :  { %v140_v25 = vmax.f32 %v137_v23, 0.0 }
 0x169   :  { %374 = vmatmul.mubr.msk.f32.vlgmr.msra.gmra.mrb[0].mxu1 %vm66_vm3, %v140_v25 }
 0x23c   :  { %v221_v30 = vpop.f32.mrb[0].mxu1 }
 0x23d   :  { %v222_v31 = vadd.f32 %v334_v29, %v221_v30  ;;  %v375_v32 = vpop.f32.mrb[1].mxu1 }
 0x23f   :  { %v225_v33 = vmax.f32 %v222_v31, 0.0 }
 0x241   :  { %385 = vmatmul.mubr.msk.f32.vlgmr.msra.gmra.mrb[2].mxu0 %vm66_vm3, %v225_v33 }
 0x314   :  { %v306_v35 = vpop.f32.mrb[2].mxu0 }
 0x315   :  { %v307_v36 = vadd.f32 %v336_v34, %v306_v35  ;;  %v386_v37 = vpop.f32.mrb[3].mxu0 }
 0x317   :  { %v338_v38 = vmul.f32 -1.442695, %v307_v36 }
 0x319   :  { %413 = vpow2.f32 %v338_v38 }
 0x323   :  { %v414_v39 = vpop.eup %413 }
 0x324   :  { %v313_v40 = vadd.f32 1.0, %v414_v39 }
 0x326   :  { %415 = vrcp.f32 %v313_v40 }
 0x330   :  { %v416_v41 = vpop.eup %415 }
 0x331   :  { %316 = vst.msk [vmem:[#allocation6] sm:$0xff] %vm45_vm1, %v416_v41 }
 0x332   :  { %450 = shalt.err (!%p447_p12)
}
 0x333   :  { %s451_s21 = scalar_lea.hbm %s597_s8, 128 }
 0x334   :  { %p452_p13 = scmp.ne.s32.totalorder %s597_s8, %s451_s21  ;;  %p455_p0 = scmp.lt.u32.totalorder %s451_s21, %s597_s8 }
 0x336   :  { %p457_p1 = pnand %p455_p0, %p452_p13 }
 0x338   :  { %460 = shalt.err (!%p457_p1)
}
 0x339   :  { %326 = dma.vmem_to_hbm [thread:$0]  %s324_s5, 128, %s597_s8, [#allocation5]  }
 0x33a   :  { %463 = dma.done.wait [#allocation5], 128  }
 0x33b   :  { %464 = vsyncadd [#allocation5], 4294967168 }
 0x33c   :  { %330 = vsyncpa [#allocation4], 1 }
 0x33d   :  { %331 = vsyncpa [#allocation5], 1 }

</bundles_post_ra>
